<compile_context>
chip_gen: v7x
topology: tpu7x:2x2x1
jax: 0.10.0
libtpu: 0.0.40
codegen_flags: <defaults>
</compile_context>

<pallas_src>
import math

import jax
import jax.numpy as jnp
from jax import lax
from jax.experimental import pallas as pl
from jax.experimental.pallas import tpu as pltpu  # noqa: F401  (TPU backend params if needed)

HIGHEST = lax.Precision.HIGHEST


# ---------------------------------------------------------------------------
# Fused Pallas kernel: zero-padded image -> 3x3 conv -> global-avg-pool -> linear
# (conv weight, pooling and linear weight are pre-combined; see expand_combined_weight)
# ---------------------------------------------------------------------------
def _make_fused_kernel(n, h, w, cin, dout_pad):
    hp = h + 2                 # padded image rows per sample
    wc = (w + 2) * cin         # flattened (padded col, channel) lane width
    inv_hw = 1.0 / float(h * w)

    def kernel(xp_ref, wexp_ref, o_ref):
        # xp_ref  : [n*hp, wc]         zero-padded NHWC image, rows=(sample,row), cols=(col,chan)
        # wexp_ref: [3, wc, dout_pad]  combined conv@linear weight, width-expanded, lane-padded
        # o_ref   : [n, dout_pad]      lane-dense output block
        acc = jnp.zeros((n, dout_pad), jnp.float32)
        for dy in range(3):                                    # static: 3 kernel-row shifts
            rows = []
            for i in range(n):                                 # static: batch samples
                slab = xp_ref[i * hp + dy:i * hp + dy + h, :]          # [h, wc]
                rows.append(jnp.sum(slab, axis=0, keepdims=True))      # sum over image rows
            hsum = jnp.concatenate(rows, axis=0)                       # [n, wc]
            acc = acc + jnp.dot(hsum, wexp_ref[dy],
                                preferred_element_type=jnp.float32,
                                precision=HIGHEST)                     # [n, dout_pad]
        o_ref[...] = (acc * inv_hw).astype(o_ref.dtype)

    return kernel


def fused_network_call(xp2, wexp, *, n, h, w, cin, dout_pad):
    hp, wc = h + 2, (w + 2) * cin
    flops = 3 * (n * h * wc) + 3 * (2 * n * wc * dout_pad) + n * dout_pad
    bytes_accessed = 4 * (xp2.size + wexp.size + n * dout_pad)
    return pl.pallas_call(
        _make_fused_kernel(n, h, w, cin, dout_pad),
        out_shape=jax.ShapeDtypeStruct((n, dout_pad), jnp.float32),
        in_specs=[
            pl.BlockSpec((n * hp, wc), lambda: (0, 0)),          # whole padded batch image
            pl.BlockSpec((3, wc, dout_pad), lambda: (0, 0, 0)),  # shared expanded weight
        ],
        out_specs=pl.BlockSpec((n, dout_pad), lambda: (0, 0)),   # unmasked (N, 128) store
        cost_estimate=pl.CostEstimate(flops=flops, transcendentals=0,
                                      bytes_accessed=bytes_accessed),
    )(xp2, wexp)


# ---------------------------------------------------------------------------
# Parameter construction (mirrors the PyTorch module shapes / init)
# ---------------------------------------------------------------------------
def kaiming_uniform(key, shape, fan_in):
    # nn.init.kaiming_uniform_(w, a=sqrt(5)) -> bound = 1/sqrt(fan_in)
    bound = 1.0 / math.sqrt(fan_in)
    return jax.random.uniform(key, shape, jnp.float32, minval=-bound, maxval=bound)


def make_params(key, cin=4, c_conv=8, d_lin_out=16, lora_dim=4, zero_init_up=True):
    ks = jax.random.split(key, 8)
    # backbone Conv2d(cin, c_conv, 3, 1, 1, bias=False): weight (Cout, Cin, 3, 3)
    conv_w = kaiming_uniform(ks[0], (c_conv, cin, 3, 3), cin * 9)
    # backbone Linear(c_conv, d_lin_out, bias=False): weight (out, in)
    lin_w = kaiming_uniform(ks[1], (d_lin_out, c_conv), c_conv)

    # conv LoRA: lora_dim = min(lora_dim, cin, c_conv); scale = alpha / lora_dim
    r_conv = min(lora_dim, cin, c_conv)
    conv_down_w = kaiming_uniform(ks[2], (r_conv, cin, 3, 3), cin * 9)
    conv_gate = jax.random.normal(ks[3], (1, r_conv, 1, 1), jnp.float32)
    conv_scale = lora_dim / r_conv

    # linear LoRA
    r_lin = lora_dim
    lin_down_w = kaiming_uniform(ks[4], (r_lin, c_conv), c_conv)
    lin_gate = jax.random.normal(ks[5], (1, r_lin), jnp.float32)
    lin_scale = lora_dim / r_lin

    if zero_init_up:
        # matches nn.init.zeros_ in the spec (LoRA path contributes exactly 0)
        conv_up_w = jnp.zeros((c_conv, r_conv, 1, 1), jnp.float32)
        lin_up_w = jnp.zeros((d_lin_out, r_lin), jnp.float32)
    else:
        # non-zero up-weights so the gated LoRA math is actually exercised by the test
        conv_up_w = kaiming_uniform(ks[6], (c_conv, r_conv, 1, 1), r_conv)
        lin_up_w = kaiming_uniform(ks[7], (d_lin_out, r_lin), r_lin)

    return dict(
        conv_w=conv_w, conv_down_w=conv_down_w, conv_up_w=conv_up_w,
        conv_gate=conv_gate, conv_scale=conv_scale,
        lin_w=lin_w, lin_down_w=lin_down_w, lin_up_w=lin_up_w,
        lin_gate=lin_gate, lin_scale=lin_scale,
    )


# ---------------------------------------------------------------------------
# One-time weight preprocessing
# ---------------------------------------------------------------------------
def fold_effective_weights(p, multiplier):
    """Fold gated LoRA into base weights and pre-multiply conv@linear.

    Returns W_comb [9*Cin, Dout]  (patch ordering (kh, kw, cin)).
    """
    c_out, cin = p["conv_w"].shape[0], p["conv_w"].shape[1]
    # conv: matmul layout with (kh, kw, cin) row ordering
    wo_c = jnp.transpose(p["conv_w"], (2, 3, 1, 0)).reshape(9 * cin, c_out)
    wd_c = jnp.transpose(p["conv_down_w"], (2, 3, 1, 0)).reshape(9 * cin, -1)
    wu_c = p["conv_up_w"][:, :, 0, 0].T                                 # (r, c_out)
    gate_c = p["conv_gate"][:, :, 0, 0]                                 # (1, r)
    w_conv_eff = wo_c + (multiplier * p["conv_scale"]) * jnp.dot(
        wd_c * gate_c, wu_c, precision=HIGHEST)                         # [9*Cin, Cout]

    wo_l = p["lin_w"].T                                                 # (Cout, Dout)
    wd_l = p["lin_down_w"].T                                            # (Cout, r)
    wu_l = p["lin_up_w"].T                                              # (r, Dout)
    gate_l = p["lin_gate"]                                              # (1, r)
    w_lin_eff = wo_l + (multiplier * p["lin_scale"]) * jnp.dot(
        wd_l * gate_l, wu_l, precision=HIGHEST)                         # [Cout, Dout]

    # pool is linear -> commute it through: y = mean(patches) @ (W_conv_eff @ W_lin_eff)
    return jnp.dot(w_conv_eff, w_lin_eff, precision=HIGHEST)            # [9*Cin, Dout]


def expand_combined_weight(w_comb, *, cin, w_spatial, dout_pad):
    """[9*Cin, Dout] -> [3, (W+2)*Cin, dout_pad].

    Folds the *width* direction of the 3x3 conv (and its zero padding) into the weight:
    row (q*Cin + c) of slice dy is the sum over kernel columns dx whose sliding window covers
    padded image column q of W_comb[(dy, dx, c), :].  With this, the kernel only needs
    per-dy row-summed images (no im2col, no in-kernel reshapes).
    """
    dout = w_comb.shape[1]
    wp = w_spatial + 2
    wc4 = w_comb.reshape(3, 3, cin, dout)                               # (dy, dx, c, d)
    slabs = []
    for dy in range(3):
        acc = jnp.zeros((wp * cin, dout), w_comb.dtype)
        for dx in range(3):
            blk = jnp.tile(wc4[dy, dx], (w_spatial, 1))                 # [W*Cin, Dout]
            acc = acc + jnp.pad(
                blk, ((dx * cin, (wp - w_spatial - dx) * cin), (0, 0)))
        slabs.append(acc)
    wexp = jnp.stack(slabs, axis=0)                                     # [3, Wp*Cin, Dout]
    if dout_pad > dout:
        wexp = jnp.pad(wexp, ((0, 0), (0, 0), (0, dout_pad - dout)))    # lane-dense (128) pad
    return wexp


# ---------------------------------------------------------------------------
# LoRANetwork forward (fused Pallas path)
# ---------------------------------------------------------------------------
def lora_network_forward(x_nchw, p, multiplier=1.0):
    n, cin, h, w = x_nchw.shape
    dout = p["lin_w"].shape[0]
    dout_pad = ((dout + 127) // 128) * 128                              # 16 -> 128 (lane-dense)

    # minimal input prep (no 9x im2col blow-up): NCHW -> NHWC, spatial zero-pad, flatten
    xh = jnp.transpose(x_nchw, (0, 2, 3, 1))                            # [N, H, W, Cin]
    xp = jnp.pad(xh, ((0, 0), (1, 1), (1, 1), (0, 0)))                  # [N, H+2, W+2, Cin]
    xp2 = xp.reshape(n * (h + 2), (w + 2) * cin)                        # rows=(n,h), cols=(w,c)

    w_comb = fold_effective_weights(p, multiplier)                      # [9*Cin, Dout]
    wexp = expand_combined_weight(w_comb, cin=cin, w_spatial=w, dout_pad=dout_pad)

    out = fused_network_call(xp2, wexp, n=n, h=h, w=w, cin=cin, dout_pad=dout_pad)
    return out[:, :dout]

    # TODO(synk): for much larger H*W, tile the image rows on an "arbitrary" grid axis and
    # accumulate the pooled sums in a VMEM scratch (v7x has only 64 MiB VMEM).


# ---------------------------------------------------------------------------
# Pure-JAX reference for verification (unfused, activation-path LoRA)
# ---------------------------------------------------------------------------
def reference_forward(x_nchw, p, multiplier=1.0):
    conv = lambda x, w, pad: lax.conv_general_dilated(
        x, w, (1, 1), pad, dimension_numbers=("NCHW", "OIHW", "NCHW"),
        precision=HIGHEST)
    c = conv(x_nchw, p["conv_w"], ((1, 1), (1, 1)))
    d = conv(x_nchw, p["conv_down_w"], ((1, 1), (1, 1))) * p["conv_gate"]
    u = conv(d, p["conv_up_w"], ((0, 0), (0, 0)))
    c = c + u * multiplier * p["conv_scale"]
    pooled = jnp.mean(c, axis=(2, 3))
    lin = jnp.dot(pooled, p["lin_w"].T, precision=HIGHEST)
    ld = jnp.dot(pooled, p["lin_down_w"].T, precision=HIGHEST) * p["lin_gate"]
    lu = jnp.dot(ld, p["lin_up_w"].T, precision=HIGHEST)
    return lin + lu * multiplier * p["lin_scale"]


if __name__ == "__main__":
    key = jax.random.PRNGKey(0)
    kx, kp = jax.random.split(key)
    x = jax.random.normal(kx, (2, 4, 16, 16), jnp.float32)   # NCHW, like PyTorch

    # Spec initializes lora_up with zeros; use non-zero up-weights here so the gated
    # LoRA path (and the weight folding) is actually exercised by the check.
    params = make_params(kp, zero_init_up=False)

    fwd = jax.jit(lora_network_forward)
    out = jax.block_until_ready(fwd(x, params))

    ref = reference_forward(x, params)
    assert out.shape == ref.shape == (2, 16)
    assert jnp.allclose(out, ref, atol=1e-4, rtol=1e-4), "mismatch vs reference"
    print("KERNEL_OK")
</pallas_src>

<mosaic_0001>
module attributes {stable_mosaic.version = 11 : i64} {
  func.func @kernel(%arg0: memref<36x72xf32, #tpu.memory_space<vmem>>, %arg1: memref<3x72x128xf32, #tpu.memory_space<vmem>>, %arg2: memref<2x128xf32, #tpu.memory_space<vmem>>) attributes {dimension_semantics = [], scalar_prefetch = 0 : i64, scratch_operands = 0 : i64, tpu.core_type = #tpu.core_type<tc>} {
    %cst = arith.constant 0.000000e+00 : f32
    %0 = vector.broadcast %cst : f32 to vector<2x128xf32>
    %c0 = arith.constant 0 : index
    %c0_0 = arith.constant 0 : index
    %1 = vector.load %arg0[%c0, %c0_0] : memref<36x72xf32, #tpu.memory_space<vmem>>, vector<16x72xf32>
    %cst_1 = arith.constant dense<0.000000e+00> : vector<72xf32>
    %2 = vector.multi_reduction <add>, %1, %cst_1 [0] : vector<16x72xf32> to vector<72xf32>
    %3 = vector.shape_cast %2 : vector<72xf32> to vector<1x72xf32>
    %c18 = arith.constant 18 : index
    %c0_2 = arith.constant 0 : index
    %4 = vector.load %arg0[%c18, %c0_2] : memref<36x72xf32, #tpu.memory_space<vmem>>, vector<16x72xf32>
    %cst_3 = arith.constant dense<0.000000e+00> : vector<72xf32>
    %5 = vector.multi_reduction <add>, %4, %cst_3 [0] : vector<16x72xf32> to vector<72xf32>
    %6 = vector.shape_cast %5 : vector<72xf32> to vector<1x72xf32>
    %7 = tpu.concatenate %3, %6 in 0 : vector<1x72xf32>, vector<1x72xf32> -> vector<2x72xf32>
    %c0_4 = arith.constant 0 : index
    %c0_5 = arith.constant 0 : index
    %c0_6 = arith.constant 0 : index
    %8 = vector.load %arg1[%c0_4, %c0_5, %c0_6] : memref<3x72x128xf32, #tpu.memory_space<vmem>>, vector<1x72x128xf32>
    %9 = vector.shape_cast %8 : vector<1x72x128xf32> to vector<72x128xf32>
    %cst_7 = arith.constant dense<0.000000e+00> : vector<2x128xf32>
    %10 = tpu.matmul %7, %9, %cst_7 {dimension_numbers = #tpu.dot_dimension_numbers<[1], [0], [0], [1], [0, 0, 1, 1], [], []>, precision = #tpu.contract_precision<fp32>} : vector<2x72xf32>, vector<72x128xf32>, vector<2x128xf32> -> vector<2x128xf32>
    %11 = arith.addf %0, %10 : vector<2x128xf32>
    %c1 = arith.constant 1 : index
    %c0_8 = arith.constant 0 : index
    %12 = vector.load %arg0[%c1, %c0_8] : memref<36x72xf32, #tpu.memory_space<vmem>>, vector<16x72xf32>
    %cst_9 = arith.constant dense<0.000000e+00> : vector<72xf32>
    %13 = vector.multi_reduction <add>, %12, %cst_9 [0] : vector<16x72xf32> to vector<72xf32>
    %14 = vector.shape_cast %13 : vector<72xf32> to vector<1x72xf32>
    %c19 = arith.constant 19 : index
    %c0_10 = arith.constant 0 : index
    %15 = vector.load %arg0[%c19, %c0_10] : memref<36x72xf32, #tpu.memory_space<vmem>>, vector<16x72xf32>
    %cst_11 = arith.constant dense<0.000000e+00> : vector<72xf32>
    %16 = vector.multi_reduction <add>, %15, %cst_11 [0] : vector<16x72xf32> to vector<72xf32>
    %17 = vector.shape_cast %16 : vector<72xf32> to vector<1x72xf32>
    %18 = tpu.concatenate %14, %17 in 0 : vector<1x72xf32>, vector<1x72xf32> -> vector<2x72xf32>
    %c1_12 = arith.constant 1 : index
    %c0_13 = arith.constant 0 : index
    %c0_14 = arith.constant 0 : index
    %19 = vector.load %arg1[%c1_12, %c0_13, %c0_14] : memref<3x72x128xf32, #tpu.memory_space<vmem>>, vector<1x72x128xf32>
    %20 = vector.shape_cast %19 : vector<1x72x128xf32> to vector<72x128xf32>
    %cst_15 = arith.constant dense<0.000000e+00> : vector<2x128xf32>
    %21 = tpu.matmul %18, %20, %cst_15 {dimension_numbers = #tpu.dot_dimension_numbers<[1], [0], [0], [1], [0, 0, 1, 1], [], []>, precision = #tpu.contract_precision<fp32>} : vector<2x72xf32>, vector<72x128xf32>, vector<2x128xf32> -> vector<2x128xf32>
    %22 = arith.addf %11, %21 : vector<2x128xf32>
    %c2 = arith.constant 2 : index
    %c0_16 = arith.constant 0 : index
    %23 = vector.load %arg0[%c2, %c0_16] : memref<36x72xf32, #tpu.memory_space<vmem>>, vector<16x72xf32>
    %cst_17 = arith.constant dense<0.000000e+00> : vector<72xf32>
    %24 = vector.multi_reduction <add>, %23, %cst_17 [0] : vector<16x72xf32> to vector<72xf32>
    %25 = vector.shape_cast %24 : vector<72xf32> to vector<1x72xf32>
    %c20 = arith.constant 20 : index
    %c0_18 = arith.constant 0 : index
    %26 = vector.load %arg0[%c20, %c0_18] : memref<36x72xf32, #tpu.memory_space<vmem>>, vector<16x72xf32>
    %cst_19 = arith.constant dense<0.000000e+00> : vector<72xf32>
    %27 = vector.multi_reduction <add>, %26, %cst_19 [0] : vector<16x72xf32> to vector<72xf32>
    %28 = vector.shape_cast %27 : vector<72xf32> to vector<1x72xf32>
    %29 = tpu.concatenate %25, %28 in 0 : vector<1x72xf32>, vector<1x72xf32> -> vector<2x72xf32>
    %c2_20 = arith.constant 2 : index
    %c0_21 = arith.constant 0 : index
    %c0_22 = arith.constant 0 : index
    %30 = vector.load %arg1[%c2_20, %c0_21, %c0_22] : memref<3x72x128xf32, #tpu.memory_space<vmem>>, vector<1x72x128xf32>
    %31 = vector.shape_cast %30 : vector<1x72x128xf32> to vector<72x128xf32>
    %cst_23 = arith.constant dense<0.000000e+00> : vector<2x128xf32>
    %32 = tpu.matmul %29, %31, %cst_23 {dimension_numbers = #tpu.dot_dimension_numbers<[1], [0], [0], [1], [0, 0, 1, 1], [], []>, precision = #tpu.contract_precision<fp32>} : vector<2x72xf32>, vector<72x128xf32>, vector<2x128xf32> -> vector<2x128xf32>
    %33 = arith.addf %22, %32 : vector<2x128xf32>
    %cst_24 = arith.constant 3.906250e-03 : f32
    %34 = vector.broadcast %cst_24 : f32 to vector<2x128xf32>
    %35 = arith.mulf %33, %34 : vector<2x128xf32>
    %c0_25 = arith.constant 0 : index
    %c0_26 = arith.constant 0 : index
    %36 = vector.load %arg2[%c0_25, %c0_26] : memref<2x128xf32, #tpu.memory_space<vmem>>, vector<2x128xf32>
    tpu.vector_store %arg2[%c0_25, %c0_26], %35 {strides = array<i32>} : memref<2x128xf32, #tpu.memory_space<vmem>>, vector<2x128xf32>,
    return
  }
}

</mosaic_0001>

<bundles_post_ra>
// kernel: lora_network_forward.1
= control target key start
LH: loop header
LB: loop body
LE: loop exit
PB: predicated region body
PF: predicated region fallthrough
CT: control target
= control target key end

     0   :  { %v3478_v3 = vmov 0.0|0.0   ;;  %vm2642_vm0 = vmmov 0   ;;  %v3476_v16 = vmov 0.0   ;;  %vm14_vm1 = vcmask 588800   ;;  %s3459_s0 = inlined_call_operand.vmem [shape: f32[36,72], index: 0, kind: input, shape index: {}]   ;;  %s3460_s1 = inlined_call_operand.vmem [shape: f32[3,72,128], index: 1, kind: input, shape index: {}]   ;;  %s3461_s2 = inlined_call_operand.hbm [shape: f32[2,128], index: 2, kind: output, shape index: {}]  }
   0x1   :  { %v2663_v0 = vld [vmem:[%s3460_s1] sm:$0xff]  ;;  %v2668_v1 = vld [vmem:[%s3460_s1 + $0x8] sm:$0xff]  ;;  %2472 = vmatprep.subr.bf16.mxu0 %v3478_v3  ;;  %2364 = vmatprep.subr.bf16.mxu1 %v3478_v3  ;;  %v2682_v6 = vld [vmem:[%s3460_s1 + $0x50] sm:$0xff] }
   0x2   :  { %v2673_v2 = vld [vmem:[%s3460_s1 + $0x48] sm:$0xff]  ;;  %v636_v4 = vand.u32 4294901760, %v2663_v0  ;;  %v639_v5 = vand.u32 4294901760, %v2668_v1  ;;  %v2688_v8 = vld [vmem:[%s3460_s1 + $0x10] sm:$0xff]  ;;  %v2693_v9 = vld [vmem:[%s3460_s1 + $0x18] sm:$0xff]  ;;  %v86_v10 = vand.u32 4294901760, %v2682_v6  ;;  %2193 = vmatprep.mubr.msk.f32.mxu0 %vm2642_vm0, %v3476_v16  ;;  %2004 = vmatprep.mubr.msk.f32.mxu1 %vm2642_vm0, %v3476_v16 }
   0x3   :  { %v83_v7 = vand.u32 4294901760, %v2673_v2  ;;  %v642_v11 = vand.u32 4294901760, %v2688_v8  ;;  %v645_v12 = vand.u32 4294901760, %v2693_v9  ;;  %v2701_v13 = vld [vmem:[%s3460_s1 + $0x58] sm:$0xff]  ;;  %v2706_v14 = vld [vmem:[%s3460_s1 + $0x60] sm:$0xff]  ;;  %v2726_v18 = vld [vmem:[%s3460_s1 + $0x28] sm:$0xff] }
   0x4   :  { %v2711_v15 = vld [vmem:[%s3460_s1 + $0x20] sm:$0xff]  ;;  %v2721_v17 = vpack.c.bf16 %v639_v5, %v636_v4  ;;  %v2731_v19 = vld [vmem:[%s3460_s1 + $0x68] sm:$0xff]  ;;  %v2736_v20 = vld [vmem:[%s3460_s1 + $0x70] sm:$0xff]  ;;  %v89_v23 = vand.u32 4294901760, %v2701_v13  ;;  %v92_v24 = vand.u32 4294901760, %v2706_v14  ;;  %v651_v26 = vand.u32 4294901760, %v2726_v18 }
   0x5   :  { %v2742_v21 = vpack.c.bf16 %v86_v10, %v83_v7  ;;  %v2749_v22 = vpack.c.bf16 %v645_v12, %v642_v11  ;;  %v648_v25 = vand.u32 4294901760, %v2711_v15  ;;  %v95_v27 = vand.u32 4294901760, %v2731_v19  ;;  %v2762_v29 = vld [vmem:[%s3460_s1 + $0x30] sm:$0xff]  ;;  %v2767_v30 = vld [vmem:[%s3460_s1 + $0x38] sm:$0xff]  ;;  %v2784_v33 = vld [vmem:[%s3460_s1 + $0x80] sm:$0xff] }
   0x6   :  { %2474 = vmatpush3.bf16.msra.mxu0 %v2721_v17  ;;  %v98_v28 = vand.u32 4294901760, %v2736_v20  ;;  %v2774_v31 = vpack.c.bf16 %v92_v24, %v89_v23  ;;  %v2779_v32 = vld [vmem:[%s3460_s1 + $0x78] sm:$0xff]  ;;  %v12_v34 = vld [vmem:[%s3459_s0] sm:$0xff]  ;;  %v654_v36 = vand.u32 4294901760, %v2762_v29  ;;  %v657_v37 = vand.u32 4294901760, %v2767_v30  ;;  %v13_v38 = vld [vmem:[%s3459_s0 + $0x8] sm:$0xff] }
   0x7   :  { %2475 = vmatprep.subr.bf16.mxu0 %v3478_v3  ;;  %2366 = vmatpush3.bf16.msra.mxu1 %v2742_v21  ;;  %v2794_v35 = vpack.c.bf16 %v651_v26, %v648_v25  ;;  %v101_v40 = vand.u32 4294901760, %v2779_v32  ;;  %v104_v41 = vand.u32 4294901760, %v2784_v33  ;;  %v24_v42 = vld [vmem:[%s3459_s0 + $0x12] sm:$0xff]  ;;  %v25_v43 = vld [vmem:[%s3459_s0 + $0x1a] sm:$0xff]  ;;  %v15_v44 = vsel %vm14_vm1, %v12_v34, 0.0  ;;  %v47_v47 = vld [vmem:[%s3459_s0 + $0x9] sm:$0xff] }
   0x8   :  { %2367 = vmatprep.subr.bf16.mxu1 %v3478_v3  ;;  %v2807_v39 = vpack.c.bf16 %v98_v28, %v95_v27  ;;  %v46_v45 = vld [vmem:[%s3459_s0 + $0x1] sm:$0xff]  ;;  %v16_v46 = vsel %vm14_vm1, %v13_v38, 0.0  ;;  %v57_v48 = vld [vmem:[%s3459_s0 + $0x13] sm:$0xff]  ;;  %v2837_v50 = vpack.c.bf16 %v657_v37, %v654_v36  ;;  %v26_v52 = vsel %vm14_vm1, %v24_v42, 0.0 }
   0x9   :  { %v58_v49 = vld [vmem:[%s3459_s0 + $0x1b] sm:$0xff]  ;;  %v17_v51 = vadd.f32 %v16_v46, %v15_v44  ;;  %v27_v53 = vsel %vm14_vm1, %v25_v43, 0.0  ;;  %v2847_v54 = vpack.c.bf16 %v104_v41, %v101_v40  ;;  %v48_v57 = vsel %vm14_vm1, %v46_v45, 0.0 }
   0xa   :  { %2477 = vmatpush3.bf16.msra.mxu0 %v2749_v22  ;;  %v2852_v55 = vld [vmem:[%s3460_s1 + $0x40] sm:$0xff]  ;;  %v28_v56 = vadd.f32 %v27_v53, %v26_v52 }
   0xb   :  { %2478 = vmatprep.subr.bf16.mxu0 %v3478_v3  ;;  %2369 = vmatpush3.bf16.msra.mxu1 %v2774_v31 }
   0xc   :  { %2370 = vmatprep.subr.bf16.mxu1 %v3478_v3 }
   0xe   :  { %2480 = vmatpush3.bf16.msra.mxu0 %v2794_v35 }
   0xf   :  { %2481 = vmatprep.subr.bf16.mxu0 %v3478_v3  ;;  %2372 = vmatpush3.bf16.msra.mxu1 %v2807_v39 }
  0x10   :  { %7 = vsyncpa [#allocation3], 0  ;;  %2373 = vmatprep.subr.bf16.mxu1 %v3478_v3  ;;  %v18_v58 = vrot.slane %v17_v51, 4  ;;  %v2859_v59 = vld [vmem:[%s3460_s1 + $0x88] sm:$0xff]  ;;  %v49_v60 = vsel %vm14_vm1, %v47_v47, 0.0  ;;  %v59_v61 = vsel %vm14_vm1, %v57_v48, 0.0 }
  0x11   :  { %v60_v62 = vsel %vm14_vm1, %v58_v49, 0.0  ;;  %v29_v63 = vrot.slane %v28_v56, 4  ;;  %v50_v34 = vadd.f32 %v49_v60, %v48_v57  ;;  %v2866_v38 = vand.u32 4294901760, %v2852_v55 }
  0x12   :  { %2483 = vmatpush3.bf16.msra.mxu0 %v2837_v50  ;;  %v19_v42 = vadd.f32 %v18_v58, %v17_v51  ;;  %v61_v43 = vadd.f32 %v60_v62, %v59_v61  ;;  %v2871_v45 = vand.u32 4294901760, %v2859_v59  ;;  %v2877_v51 = vsub.f32 %v2673_v2, %v83_v7 }
  0x13   :  { %2191 = vmatprep.subr.mxu0 %v3476_v16  ;;  %2375 = vmatpush3.bf16.msra.mxu1 %v2847_v54  ;;  %v30_v44 = vadd.f32 %v29_v63, %v28_v56  ;;  %v51_v46 = vrot.slane %v50_v34, 4  ;;  %v2883_v56 = vsub.f32 %v2682_v6, %v86_v10  ;;  %v2891_v7 = vsub.f32 %v2663_v0, %v636_v4 }
  0x14   :  { %v20_v47 = vrot.slane %v19_v42, 2  ;;  %2002 = vmatprep.subr.mxu1 %v3476_v16  ;;  %v62_v48 = vrot.slane %v61_v43, 4  ;;  %v2896_v6 = vsub.f32 %v2668_v1, %v639_v5  ;;  %vm35_vm2 = vcmask 1040384  }
  0x15   :  { %v31_v49 = vrot.slane %v30_v44, 2  ;;  %v52_v52 = vadd.f32 %v51_v46, %v50_v34  ;;  %v3468_v4 = vand.u32 4294901760, %v2883_v56  ;;  %v2908_v1 = vsub.f32 %v2688_v8, %v642_v11 }
  0x16   :  { %2192 = vmatpush3.msra.mxu0 %v2866_v38  ;;  %v21_v53 = vadd.f32 %v20_v47, %v19_v42  ;;  %v63_v57 = vadd.f32 %v62_v48, %v61_v43  ;;  %v3475_v42 = vand.u32 4294901760, %v2877_v51  ;;  %v2902_v43 = vsub.f32 %v2701_v13, %v89_v23 }
  0x17   :  { %2484 = vmatprep.subr.bf16.mxu0 %v3478_v3  ;;  %v32_v58 = vadd.f32 %v31_v49, %v30_v44  ;;  %2003 = vmatpush3.msra.mxu1 %v2871_v45  ;;  %v53_v60 = vrot.slane %v52_v52, 2  ;;  %3490 = vst [vmem:[#allocation5_spill] sm:$0xff] %v2908_v1  ;;  %v2913_v5 = vsub.f32 %v2706_v14, %v92_v24  ;;  %v722_v13 = vand.u32 4294901760, %v2891_v7 }
  0x18   :  { %v22_v61 = vrot.slane %v21_v53, 1  ;;  %2376 = vmatprep.subr.bf16.mxu1 %v3478_v3  ;;  %v64_v2 = vrot.slane %v63_v57, 2  ;;  %v729_v23 = vand.u32 4294901760, %v2896_v6  ;;  %v2921_v49 = vsub.f32 %v2693_v9, %v645_v12 }
  0x19   :  { %v33_v10 = vrot.slane %v32_v58, 1  ;;  %v54_v62 = vadd.f32 %v53_v60, %v52_v52  ;;  %v170_v14 = vsub.f32 %v2877_v51, %v3475_v42  ;;  %v2930_v24 = vsub.f32 %v2711_v15, %v648_v25 }
  0x1a   :  { %v23_v63 = vadd.f32 %v22_v61, %v21_v53  ;;  %v65_v34 = vadd.f32 %v64_v2, %v63_v57  ;;  %v177_v53 = vsub.f32 %v2883_v56, %v3468_v4  ;;  %v3466_v9 = vand.u32 4294901760, %v2902_v43 }
  0x1b   :  { %v34_v44 = vadd.f32 %v33_v10, %v32_v58  ;;  %v55_v0 = vrot.slane %v54_v62, 1  ;;  %3491 = vst [vmem:[#allocation6_spill] sm:$0xff] %v2930_v24  ;;  %v2941_v12 = vsub.f32 %v2726_v18, %v651_v26  ;;  %v2946_v57 = vsub.f32 %v2731_v19, %v95_v27 }
  0x1c   :  { %v66_v46 = vrot.slane %v65_v34, 1  ;;  %v3465_v25 = vand.u32 4294901760, %v2913_v5  ;;  %v2953_v58 = vsub.f32 %v2736_v20, %v98_v28  ;;  %v2485_v18 = vpack.c.bf16 %v729_v23, %v722_v13 }
  0x1d   :  { %v36_v47 = vsel %vm35_vm2, %v23_v63, %v34_v44  ;;  %v56_v48 = vadd.f32 %v55_v0, %v54_v62  ;;  %3492 = vst [vmem:[#allocation7_spill] sm:$0xff] %v2941_v12  ;;  %v171_v27 = vand.u32 4294901760, %v170_v14  ;;  %v736_v61 = vand.u32 4294901760, %v2908_v1 }
  0x1e   :  { %v633_v8 = vsel %vm14_vm1, %v36_v47, 0  ;;  %v67_v11 = vadd.f32 %v66_v46, %v65_v34  ;;  %v743_v2 = vand.u32 4294901760, %v2921_v49  ;;  %v178_v28 = vand.u32 4294901760, %v177_v53 }
  0x1f   :  { %v2932_v52 = vand.u32 4294901760, %v633_v8  ;;  %v184_v10 = vsub.f32 %v2902_v43, %v3466_v9  ;;  %v750_v62 = vand.u32 4294901760, %v2930_v24  ;;  %v191_v34 = vsub.f32 %v2913_v5, %v3465_v25 }
  0x20   :  { %v68_v15 = vsel %vm35_vm2, %v56_v48, %v67_v11  ;;  %v757_v44 = vand.u32 4294901760, %v2941_v12  ;;  %v3463_v0 = vand.u32 4294901760, %v2946_v57  ;;  %v2983_v46 = vsub.f32 %v2762_v29, %v654_v36 }
  0x21   :  { %v2956_v60 = vsub.f32 %v633_v8, %v2932_v52  ;;  %v80_v19 = vsel %vm14_vm1, %v68_v15, 0  ;;  %v2988_v47 = vsub.f32 %v2779_v32, %v101_v40  ;;  %v2993_v48 = vsub.f32 %v2784_v33, %v104_v41 }
  0x22   :  { %v2963_v26 = vand.u32 4294901760, %v80_v19  ;;  %3493 = vst [vmem:[#allocation8_spill] sm:$0xff] %v2983_v46  ;;  %v3464_v8 = vand.u32 4294901760, %v2953_v58  ;;  %v3001_v29 = vsub.f32 %v2767_v30, %v657_v37  ;;  %v2488_v32 = vpack.c.bf16 %v743_v2, %v736_v61  ;;  %v1185_v30 = vld [vmem:[%s3459_s0 + $0x2] sm:$0xff]  ;;  %v1186_v37 = vld [vmem:[%s3459_s0 + $0xa] sm:$0xff] }
  0x23   :  { %v3462_v20 = vand.u32 4294901760, %v2956_v60  ;;  %v2377_v33 = vpack.c.bf16 %v178_v28, %v171_v27  ;;  %v185_v40 = vand.u32 4294901760, %v184_v10  ;;  %v192_v11 = vand.u32 4294901760, %v191_v34  ;;  %v1196_v28 = vld [vmem:[%s3459_s0 + $0x14] sm:$0xff] }
  0x24   :  { %v2973_v63 = vsub.f32 %v80_v19, %v2963_v26  ;;  %3494 = vst [vmem:[#allocation9_spill] sm:$0xff] %v3001_v29  ;;  %v2491_v14 = vpack.c.bf16 %v757_v44, %v750_v62  ;;  %v198_v53 = vsub.f32 %v2946_v57, %v3463_v0  ;;  %v205_v15 = vsub.f32 %v2953_v58, %v3464_v8  ;;  %v1197_v8 = vld [vmem:[%s3459_s0 + $0x1c] sm:$0xff] }
  0x25   :  { %2194 = vmatmul.mubr.f32.vlgmr.msra.gmra.mrb[0].mxu0 %v3462_v20  ;;  %v3472_v19 = vand.u32 4294901760, %v2988_v47  ;;  %v3469_v27 = vand.u32 4294901760, %v2993_v48  ;;  %v771_v34 = vand.u32 4294901760, %v3001_v29  ;;  %v1187_v20 = vsel %vm14_vm1, %v1185_v30, 0.0 }
  0x26   :  { %2486 = vmatpush3.bf16.msra.mxu0 %v2485_v18  ;;  %v3467_v36 = vand.u32 4294901760, %v2973_v63  ;;  %2214 = vmatprep.mubr.msk.f32.mxu0 %vm2642_vm0, %v3476_v16  ;;  %v764_v18 = vand.u32 4294901760, %v2983_v46  ;;  %v1188_v0 = vsel %vm14_vm1, %v1186_v37, 0.0  ;;  %v3044_v25 = vsub.f32 %v2859_v59, %v2871_v45 }
  0x27   :  { %2487 = vmatprep.subr.bf16.mxu0 %v3478_v3  ;;  %v2380_v9 = vpack.c.bf16 %v192_v11, %v185_v40  ;;  %v206_v30 = vand.u32 4294901760, %v205_v15  ;;  %v212_v37 = vsub.f32 %v2988_v47, %v3472_v19  ;;  %v219_v4 = vsub.f32 %v2993_v48, %v3469_v27 }
  0x28   :  { %v159_v41 = vsub.f32 %v2973_v63, %v3467_v36  ;;  %v1198_v36 = vsel %vm14_vm1, %v1196_v28, 0.0  ;;  %v1199_v59 = vsel %vm14_vm1, %v1197_v8, 0.0 }
  0x29   :  { %v1200_v40 = vadd.f32 %v1199_v59, %v1198_v36  ;;  %v213_v15 = vand.u32 4294901760, %v212_v37  ;;  %v220_v28 = vand.u32 4294901760, %v219_v4 }
  0x2a   :  { %v160_v10 = vand.u32 4294901760, %v159_v41  ;;  %2489 = vmatpush3.bf16.msra.mxu0 %v2488_v32  ;;  %v199_v41 = vand.u32 4294901760, %v198_v53  ;;  %v1189_v32 = vadd.f32 %v1188_v0, %v1187_v20  ;;  %v3059_v20 = vsub.f32 %v2852_v55, %v2866_v38 }
  0x2b   :  { %2490 = vmatprep.subr.bf16.mxu0 %v3478_v3  ;;  %v2494_v0 = vpack.c.bf16 %v771_v34, %v764_v18  ;;  %v1201_v53 = vrot.slane %v1200_v40, 4  ;;  %v3471_v55 = vand.u32 4294901760, %v3044_v25 }
  0x2c   :  { %2005 = vmatmul.mubr.f32.vlgmr.msra.gmra.mrb[0].mxu1 %v160_v10  ;;  %v2383_v8 = vpack.c.bf16 %v206_v30, %v199_v41 }
  0x2d   :  { %2378 = vmatpush3.bf16.msra.mxu1 %v2377_v33  ;;  %2025 = vmatprep.mubr.msk.f32.mxu1 %vm2642_vm0, %v3476_v16  ;;  %v1190_v33 = vrot.slane %v1189_v32, 4  ;;  %v1202_v27 = vadd.f32 %v1201_v53, %v1200_v40  ;;  %v737_v40 = vsub.f32 %v2908_v1, %v736_v61  ;;  %v2392_v61 = vpack.c.bf16 %v2913_v5, %v2902_v43 }
  0x2e   :  { %2379 = vmatprep.subr.bf16.mxu1 %v3478_v3  ;;  %2492 = vmatpush3.bf16.msra.mxu0 %v2491_v14  ;;  %v3470_v14 = vand.u32 4294901760, %v3059_v20 }
  0x2f   :  { %2493 = vmatprep.subr.bf16.mxu0 %v3478_v3  ;;  %v1191_v11 = vadd.f32 %v1190_v33, %v1189_v32  ;;  %v1203_v59 = vrot.slane %v1202_v27, 2  ;;  %v2386_v32 = vpack.c.bf16 %v220_v28, %v213_v15  ;;  %v2389_v33 = vpack.c.bf16 %v2883_v56, %v2877_v51 }
  0x31   :  { %2381 = vmatpush3.bf16.msra.mxu1 %v2380_v9  ;;  %v1192_v10 = vrot.slane %v1191_v11, 2  ;;  %v226_v9 = vsub.f32 %v3044_v25, %v3471_v55  ;;  %v1204_v4 = vadd.f32 %v1203_v59, %v1202_v27  ;;  %v723_v27 = vsub.f32 %v2891_v7, %v722_v13  ;;  %v1797_v59 = vld [vmem:[%s3460_s1 + $0x90] sm:$0xff] }
  0x32   :  { %2382 = vmatprep.subr.bf16.mxu1 %v3478_v3  ;;  %2495 = vmatpush3.bf16.msra.mxu0 %v2494_v0  ;;  %v730_v0 = vsub.f32 %v2896_v6, %v729_v23  ;;  %v738_v23 = vand.u32 4294901760, %v737_v40 }
  0x33   :  { %2212 = vmatprep.subr.mxu0 %v3476_v16  ;;  %v1193_v36 = vadd.f32 %v1192_v10, %v1191_v11  ;;  %v1205_v30 = vrot.slane %v1204_v4, 1  ;;  %v227_v37 = vand.u32 4294901760, %v226_v9  ;;  %v744_v11 = vsub.f32 %v2921_v49, %v743_v2 }
  0x34   :  { %v724_v13 = vand.u32 4294901760, %v723_v27  ;;  %v731_v15 = vand.u32 4294901760, %v730_v0  ;;  %v751_v10 = vsub.f32 %v2930_v24, %v750_v62  ;;  %v1798_v62 = vld [vmem:[%s3460_s1 + $0x98] sm:$0xff] }
  0x35   :  { %2384 = vmatpush3.bf16.msra.mxu1 %v2383_v8  ;;  %v1194_v41 = vrot.slane %v1193_v36, 1  ;;  %v1206_v8 = vadd.f32 %v1205_v30, %v1204_v4  ;;  %v745_v28 = vand.u32 4294901760, %v744_v11  ;;  %v765_v4 = vsub.f32 %v2983_v46, %v764_v18 }
  0x36   :  { %2385 = vmatprep.subr.bf16.mxu1 %v3478_v3  ;;  %2213 = vmatpush3.msra.mxu0 %v3470_v14  ;;  %v3107_v2 = vpack.c.bf16 %v731_v15, %v724_v13  ;;  %v752_v9 = vand.u32 4294901760, %v751_v10  ;;  %v1225_v40 = vand.u32 4294901760, %v1798_v62  ;;  %v1799_v13 = vld [vmem:[%s3460_s1 + $0xa0] sm:$0xff]  ;;  %v1800_v15 = vld [vmem:[%s3460_s1 + $0xa8] sm:$0xff] }
  0x37   :  { %2496 = vmatprep.subr.bf16.mxu0 %v3478_v3  ;;  %2215 = vmatmul.mubr.f32.vlgmr.msra.gmra.mrb[0].mxu0 %v2932_v52  ;;  %v1195_v53 = vadd.f32 %v1194_v41, %v1193_v36  ;;  %v758_v36 = vsub.f32 %v2941_v12, %v757_v44  ;;  %v772_v44 = vsub.f32 %v3001_v29, %v771_v34  ;;  %v766_v27 = vand.u32 4294901760, %v765_v4  ;;  %v1801_v4 = vld [vmem:[%s3460_s1 + $0xb0] sm:$0xff] }
  0x38   :  { %2498 = vmatpush3.bf16.msra.mxu0 %v2721_v17  ;;  %2235 = vmatprep.mubr.msk.f32.mxu0 %vm2642_vm0, %v3476_v16  ;;  %v3495_v29 = vmov 0.0|0.0  }
  0x39   :  { %2387 = vmatpush3.bf16.msra.mxu1 %v2386_v32  ;;  %2499 = vmatprep.subr.bf16.mxu0 %v3478_v3  ;;  %v3120_v32 = vpack.c.bf16 %v745_v28, %v738_v23  ;;  %v1207_v41 = vsel %vm35_vm2, %v1195_v53, %v1206_v8  ;;  %v759_v30 = vand.u32 4294901760, %v758_v36  ;;  %v773_v0 = vand.u32 4294901760, %v772_v44  ;;  %v1802_v44 = vld [vmem:[%s3460_s1 + $0xb8] sm:$0xff] }
  0x3a   :  { %2023 = vmatprep.subr.mxu1 %v3476_v16  ;;  %v2395_v8 = vpack.c.bf16 %v2953_v58, %v2946_v57  ;;  %v1219_v28 = vsel %vm14_vm1, %v1207_v41, 0  ;;  %v1231_v36 = vand.u32 4294901760, %v1800_v15  ;;  %v1237_v53 = vand.u32 4294901760, %v1802_v44 }
  0x3b   :  { %v3138_v11 = vpack.c.bf16 %v759_v30, %v752_v9  ;;  %v3150_v23 = vpack.c.bf16 %v773_v0, %v766_v27  ;;  %v2398_v9 = vpack.c.bf16 %v2993_v48, %v2988_v47  ;;  %v3166_v30 = vand.u32 4294901760, %v1219_v28 }
  0x3c   :  { %2501 = vmatpush3.bf16.msra.mxu0 %v2749_v22  ;;  %v3172_v27 = vsub.f32 %v1798_v62, %v1225_v40  ;;  %v3184_v62 = vsub.f32 %v1800_v15, %v1231_v36  ;;  %v3210_v55 = vsub.f32 %v1802_v44, %v1237_v53  ;;  %v1805_v44 = vld [vmem:[%s3460_s1 + $0xd0] sm:$0xff] }
  0x3d   :  { %2024 = vmatpush3.msra.mxu1 %v227_v37  ;;  %2502 = vmatprep.subr.bf16.mxu0 %v3478_v3  ;;  %v3193_v34 = vsub.f32 %v1219_v28, %v3166_v30 }
  0x3e   :  { %2388 = vmatprep.subr.bf16.mxu1 %v3478_v3  ;;  %2026 = vmatmul.mubr.f32.vlgmr.msra.gmra.mrb[0].mxu1 %v2963_v26  ;;  %v3485_v14 = vand.u32 4294901760, %v3184_v62  ;;  %v3488_v46 = vand.u32 4294901760, %v3210_v55 }
  0x3f   :  { %2390 = vmatpush3.bf16.msra.mxu1 %v2389_v33  ;;  %2046 = vmatprep.mubr.msk.f32.mxu1 %vm2642_vm0, %v3476_v16  ;;  %v1222_v33 = vand.u32 4294901760, %v1797_v59  ;;  %v3482_v28 = vand.u32 4294901760, %v3193_v34 }
  0x40   :  { %2391 = vmatprep.subr.bf16.mxu1 %v3478_v3  ;;  %2504 = vmatpush3.bf16.msra.mxu0 %v2794_v35  ;;  %v1330_v42 = vsub.f32 %v3184_v62, %v3485_v14 }
  0x41   :  { %2505 = vmatprep.subr.bf16.mxu0 %v3478_v3  ;;  %v3156_v10 = vpack.c.bf16 %v1225_v40, %v1222_v33  ;;  %v3170_v41 = vsub.f32 %v1797_v59, %v1222_v33  ;;  %v1803_v33 = vld [vmem:[%s3460_s1 + $0xc0] sm:$0xff]  ;;  %v1804_v40 = vld [vmem:[%s3460_s1 + $0xc8] sm:$0xff]  ;;  %s2644_s1 = smov [#allocation2]  }
  0x42   :  { %v1331_v12 = vand.u32 4294901760, %v1330_v42  ;;  %s1780_s30 = sshll.u32 %s2644_s1, 4  ;;  %s1781_s30 = int_to_ptr.vmem [resolvable:$true] %s1780_s30 }
  0x43   :  { %2393 = vmatpush3.bf16.msra.mxu1 %v2392_v61  ;;  %v1228_v61 = vand.u32 4294901760, %v1799_v13  ;;  %s2617_s3 = scalar_lea.vmem %s1781_s30, 32  ;;  %p2622_p1 = scmp.lt.s32.totalorder %s1781_s30, %s1781_s30 }
  0x44   :  { %2394 = vmatprep.subr.bf16.mxu1 %v3478_v3  ;;  %2507 = vmatpush3.bf16.msra.mxu0 %v2837_v50  ;;  %p2618_p0 = scmp.ne.s32.totalorder %s1781_s30, %s2617_s3  ;;  %p2623_p2 = scmp.lt.s32.totalorder %s2617_s3, %s2617_s3 }
  0x45   :  { %2233 = vmatprep.subr.mxu0 %v3476_v16  ;;  %v3177_v0 = vpack.c.bf16 %v1231_v36, %v1228_v61  ;;  %v3182_v59 = vsub.f32 %v1799_v13, %v1228_v61  ;;  %v3473_v13 = vand.u32 4294901760, %v3172_v27  ;;  %v1240_v61 = vand.u32 4294901760, %v1803_v33 }
  0x46   :  { %v1243_v36 = vand.u32 4294901760, %v1804_v40  ;;  %p2624_p3 = por %p2623_p2, %p2622_p1 }
  0x47   :  { %2396 = vmatpush3.bf16.msra.mxu1 %v2395_v8  ;;  %v1234_v8 = vand.u32 4294901760, %v1801_v4  ;;  %v3483_v37 = vand.u32 4294901760, %v3182_v59 }
  0x48   :  { %2397 = vmatprep.subr.bf16.mxu1 %v3478_v3  ;;  %2234 = vmatpush3.msra.mxu0 %v2866_v38  ;;  %p2625_p4 = pnand %p2624_p3, %p2618_p0 }
  0x49   :  { %2508 = vmatprep.subr.bf16.mxu0 %v3478_v3  ;;  %2236 = vmatmul.mubr.f32.vlgmr.msra.gmra.mrb[0].mxu0 %v2932_v52  ;;  %v3199_v15 = vpack.c.bf16 %v1237_v53, %v1234_v8  ;;  %v3203_v18 = vsub.f32 %v1801_v4, %v1234_v8  ;;  %v1316_v4 = vsub.f32 %v3172_v27, %v3473_v13 }
  0x4a   :  { %2510 = vmatpush3.bf16.msra.mxu0 %v3156_v10  ;;  %2256 = vmatprep.mubr.msk.f32.mxu0 %vm2642_vm0, %v3476_v16  ;;  %v3223_v8 = vpack.c.bf16 %v1243_v36, %v1240_v61  ;;  %v3225_v53 = vsub.f32 %v1803_v33, %v1240_v61  ;;  %v1298_v13 = vsub.f32 %v3193_v34, %v3482_v28  ;;  %v3247_v28 = vand.u32 4294901760, %v1805_v44 }
  0x4b   :  { %2399 = vmatpush3.bf16.msra.mxu1 %v2398_v9  ;;  %2511 = vmatprep.subr.bf16.mxu0 %v3478_v3  ;;  %v3474_v9 = vand.u32 4294901760, %v3170_v41  ;;  %v1336_v33 = vand.u32 4294901760, %v3203_v18  ;;  %v3241_v61 = vsub.f32 %v1804_v40, %v1243_v36  ;;  %v1344_v36 = vsub.f32 %v3210_v55, %v3488_v46 }
  0x4c   :  { %2044 = vmatprep.subr.mxu1 %v3476_v16  ;;  %v1299_v24 = vand.u32 4294901760, %v1298_v13  ;;  %v3262_v42 = vsub.f32 %v1805_v44, %v3247_v28 }
  0x4d   :  { %v1309_v19 = vsub.f32 %v3170_v41, %v3474_v9  ;;  %v1323_v9 = vsub.f32 %v3182_v59, %v3483_v37  ;;  %v3496_v37 = vmov 0.0   ;;  %v3489_v1 = vand.u32 4294901760, %v3241_v61 }
  0x4e   :  { %2513 = vmatpush3.bf16.msra.mxu0 %v3177_v0 }
  0x4f   :  { %2045 = vmatpush3.msra.mxu1 %v3044_v25  ;;  %2514 = vmatprep.subr.bf16.mxu0 %v3478_v3  ;;  %v1324_v14 = vand.u32 4294901760, %v1323_v9  ;;  %v1345_v9 = vand.u32 4294901760, %v1344_v36  ;;  %v1358_v46 = vsub.f32 %v3241_v61, %v3489_v1  ;;  %v1364_v36 = vand.u32 4294901760, %v3262_v42 }
  0x50   :  { %2400 = vmatprep.subr.bf16.mxu1 %v3478_v3  ;;  %2047 = vmatmul.mubr.f32.vlgmr.msra.gmra.mrb[0].mxu1 %v2973_v63  ;;  %v3499_v1 = vand.u32 4294901760, %v2973_v63 }
  0x51   :  { %2402 = vmatpush3.bf16.msra.mxu1 %v2742_v21  ;;  %2067 = vmatprep.mubr.msk.f32.mxu1 %vm2642_vm0, %v3476_v16  ;;  %v1310_v16 = vand.u32 4294901760, %v1309_v19  ;;  %v1337_v19 = vsub.f32 %v3203_v18, %v1336_v33 }
  0x52   :  { %2403 = vmatprep.subr.bf16.mxu1 %v3478_v3  ;;  %2516 = vmatpush3.bf16.msra.mxu0 %v3199_v15 }
  0x53   :  { %2517 = vmatprep.subr.bf16.mxu0 %v3478_v3  ;;  %v1317_v3 = vand.u32 4294901760, %v1316_v4  ;;  %v1350_v4 = vand.u32 4294901760, %v3225_v53 }
  0x55   :  { %2405 = vmatpush3.bf16.msra.mxu1 %v2774_v31  ;;  %v2521_v40 = vpack.c.bf16 %v1317_v3, %v1310_v16  ;;  %v1338_v3 = vand.u32 4294901760, %v1337_v19  ;;  %v2524_v16 = vpack.c.bf16 %v1331_v12, %v1324_v14  ;;  %v1351_v13 = vsub.f32 %v3225_v53, %v1350_v4 }
  0x56   :  { %2406 = vmatprep.subr.bf16.mxu1 %v3495_v29  ;;  %2519 = vmatpush3.bf16.msra.mxu0 %v3223_v8  ;;  %v3498_v12 = vand.u32 4294901760, %v2883_v56  ;;  %v3501_v56 = vand.u32 4294901760, %v2913_v5 }
  0x57   :  { %2254 = vmatprep.subr.mxu0 %v3496_v37  ;;  %v2527_v44 = vpack.c.bf16 %v1345_v9, %v1338_v3  ;;  %v1352_v19 = vand.u32 4294901760, %v1351_v13  ;;  %v1365_v3 = vsub.f32 %v3262_v42, %v1364_v36  ;;  %v2533_v9 = vpack.c.bf16 %v3172_v27, %v3170_v41 }
  0x58   :  { %v3504_v13 = vand.u32 4294901760, %v2988_v47  ;;  %v3506_v47 = vand.u32 4294901760, %v3044_v25  ;;  %v3512_v25 = vand.u32 4294901760, %v3184_v62 }
  0x59   :  { %2408 = vmatpush3.bf16.msra.mxu1 %v2807_v39  ;;  %v1366_v63 = vand.u32 4294901760, %v1365_v3 }
  0x5a   :  { %2409 = vmatprep.subr.bf16.mxu1 %v3495_v29  ;;  %2255 = vmatpush3.msra.mxu0 %v3247_v28 }
  0x5b   :  { %2520 = vmatprep.subr.bf16.mxu0 %v3495_v29  ;;  %2257 = vmatmul.mubr.f32.vlgmr.msra.gmra.mrb[0].mxu0 %v1299_v24  ;;  %v3497_v24 = vand.u32 4294901760, %v2877_v51  ;;  %v3500_v51 = vand.u32 4294901760, %v2902_v43  ;;  %v3503_v43 = vand.u32 4294901760, %v2953_v58  ;;  %v2539_v58 = vpack.c.bf16 %v3210_v55, %v3203_v18 }
  0x5c   :  { %2522 = vmatpush3.bf16.msra.mxu0 %v2521_v40  ;;  %2277 = vmatprep.mubr.msk.f32.mxu0 %vm2642_vm0, %v3496_v37  ;;  %v1359_v40 = vand.u32 4294901760, %v1358_v46  ;;  %v3516_v18 = vpack.c.bf16 %v2896_v6, %v2891_v7  ;;  %v3519_v7 = vld [vmem:[#allocation7_spill] sm:$0xff]  ;;  %v3520_v6 = vld [vmem:[#allocation6_spill] sm:$0xff] }
  0x5d   :  { %2411 = vmatpush3.bf16.msra.mxu1 %v2847_v54  ;;  %2523 = vmatprep.subr.bf16.mxu0 %v3495_v29  ;;  %v2413_v14 = vpack.c.bf16 %v3498_v12, %v3497_v24  ;;  %v3505_v24 = vand.u32 4294901760, %v2993_v48  ;;  %v2542_v48 = vpack.c.bf16 %v3241_v61, %v3225_v53 }
  0x5e   :  { %2065 = vmatprep.subr.mxu1 %v3496_v37  ;;  %v2530_v46 = vpack.c.bf16 %v1359_v40, %v1352_v19 }
  0x5f   :  { %v2422_v12 = vpack.c.bf16 %v3505_v24, %v3504_v13 }
  0x60   :  { %2525 = vmatpush3.bf16.msra.mxu0 %v2524_v16  ;;  %v2416_v16 = vpack.c.bf16 %v3501_v56, %v3500_v51 }
  0x61   :  { %2066 = vmatpush3.msra.mxu1 %v2871_v45  ;;  %2526 = vmatprep.subr.bf16.mxu0 %v3495_v29 }
  0x62   :  { %2412 = vmatprep.subr.bf16.mxu1 %v3495_v29  ;;  %2068 = vmatmul.mubr.f32.vlgmr.msra.gmra.mrb[0].mxu1 %v3499_v1  ;;  %v3502_v1 = vand.u32 4294901760, %v2946_v57  ;;  %v2536_v57 = vpack.c.bf16 %v3184_v62, %v3182_v59 }
  0x63   :  { %2414 = vmatpush3.bf16.msra.mxu1 %v2413_v14  ;;  %2088 = vmatprep.mubr.msk.f32.mxu1 %vm2642_vm0, %v3496_v37 }
  0x64   :  { %2415 = vmatprep.subr.bf16.mxu1 %v3495_v29  ;;  %2528 = vmatpush3.bf16.msra.mxu0 %v2527_v44  ;;  %v2419_v5 = vpack.c.bf16 %v3503_v43, %v3502_v1 }
  0x65   :  { %2529 = vmatprep.subr.bf16.mxu0 %v3495_v29 }
  0x67   :  { %2417 = vmatpush3.bf16.msra.mxu1 %v2416_v16 }
  0x68   :  { %2418 = vmatprep.subr.bf16.mxu1 %v3495_v29  ;;  %2531 = vmatpush3.bf16.msra.mxu0 %v2530_v46 }
  0x69   :  { %2275 = vmatprep.subr.mxu0 %v3496_v37 }
  0x6b   :  { %2420 = vmatpush3.bf16.msra.mxu1 %v2419_v5 }
  0x6c   :  { %2421 = vmatprep.subr.bf16.mxu1 %v3495_v29  ;;  %2276 = vmatpush3.msra.mxu0 %v1366_v63 }
  0x6d   :  { %2532 = vmatprep.subr.bf16.mxu0 %v3495_v29  ;;  %2278 = vmatmul.mubr.f32.vlgmr.msra.gmra.mrb[0].mxu0 %v3166_v30 }
  0x6e   :  { %2534 = vmatpush3.bf16.msra.mxu0 %v2533_v9  ;;  %2298 = vmatprep.mubr.msk.f32.mxu0 %vm2642_vm0, %v3496_v37 }
  0x6f   :  { %2423 = vmatpush3.bf16.msra.mxu1 %v2422_v12  ;;  %2535 = vmatprep.subr.bf16.mxu0 %v3495_v29 }
  0x70   :  { %2086 = vmatprep.subr.mxu1 %v3496_v37 }
  0x72   :  { %2537 = vmatpush3.bf16.msra.mxu0 %v2536_v57 }
  0x73   :  { %2087 = vmatpush3.msra.mxu1 %v3506_v47  ;;  %2538 = vmatprep.subr.bf16.mxu0 %v3495_v29 }
  0x74   :  { %2424 = vmatprep.subr.bf16.mxu1 %v3495_v29  ;;  %2089 = vmatmul.mubr.f32.vlgmr.msra.gmra.mrb[0].mxu1 %v2963_v26 }
  0x75   :  { %2426 = vmatpush3.bf16.msra.mxu1 %v2742_v21  ;;  %2109 = vmatprep.mubr.msk.f32.mxu1 %vm2642_vm0, %v3496_v37  ;;  %v3507_v21 = vand.u32 4294901760, %v3170_v41 }
  0x76   :  { %2427 = vmatprep.subr.bf16.mxu1 %v3495_v29  ;;  %2540 = vmatpush3.bf16.msra.mxu0 %v2539_v58 }
  0x77   :  { %2541 = vmatprep.subr.bf16.mxu0 %v3495_v29 }
  0x79   :  { %2429 = vmatpush3.bf16.msra.mxu1 %v2774_v31 }
  0x7a   :  { %2430 = vmatprep.subr.bf16.mxu1 %v3495_v29  ;;  %2543 = vmatpush3.bf16.msra.mxu0 %v2542_v48 }
  0x7b   :  { %2296 = vmatprep.subr.mxu0 %v3496_v37 }
  0x7d   :  { %2432 = vmatpush3.bf16.msra.mxu1 %v2807_v39  ;;  %v3509_v39 = vand.u32 4294901760, %v2956_v60 }
  0x7e   :  { %2433 = vmatprep.subr.bf16.mxu1 %v3495_v29  ;;  %2297 = vmatpush3.msra.mxu0 %v3262_v42 }
  0x7f   :  { %2544 = vmatprep.subr.bf16.mxu0 %v3495_v29  ;;  %2299 = vmatmul.mubr.f32.vlgmr.msra.gmra.mrb[0].mxu0 %v3193_v34 }
  0x80   :  { %2546 = vmatpush3.bf16.msra.mxu0 %v3156_v10  ;;  %2319 = vmatprep.mubr.msk.f32.mxu0 %vm2642_vm0, %v3496_v37 }
  0x81   :  { %2435 = vmatpush3.bf16.msra.mxu1 %v2847_v54  ;;  %2547 = vmatprep.subr.bf16.mxu0 %v3495_v29  ;;  %v712_v54 = vsub.f32 %v2956_v60, %v3509_v39 }
  0x82   :  { %2107 = vmatprep.subr.mxu1 %v3496_v37 }
  0x84   :  { %2549 = vmatpush3.bf16.msra.mxu0 %v3177_v0 }
  0x85   :  { %2108 = vmatpush3.msra.mxu1 %v2871_v45  ;;  %2550 = vmatprep.subr.bf16.mxu0 %v3495_v29  ;;  %v3511_v45 = vand.u32 4294901760, %v3182_v59 }
  0x86   :  { %2436 = vmatprep.subr.bf16.mxu1 %v3495_v29  ;;  %2110 = vmatmul.mubr.f32.vlgmr.msra.gmra.mrb[0].mxu1 %v2963_v26 }
  0x87   :  { %2438 = vmatpush3.bf16.msra.mxu1 %v2721_v17  ;;  %2130 = vmatprep.mubr.msk.f32.mxu1 %vm2642_vm0, %v3496_v37  ;;  %v3508_v17 = vand.u32 4294901760, %v3172_v27  ;;  %v2560_v26 = vpack.c.bf16 %v3512_v25, %v3511_v45  ;;  %v3523_v27 = vld [vmem:[#allocation8_spill] sm:$0xff] }
  0x88   :  { %2439 = vmatprep.subr.bf16.mxu1 %v3495_v29  ;;  %2552 = vmatpush3.bf16.msra.mxu0 %v3199_v15 }
  0x89   :  { %2553 = vmatprep.subr.bf16.mxu0 %v3495_v29  ;;  %v2557_v31 = vpack.c.bf16 %v3508_v17, %v3507_v21 }
  0x8b   :  { %2441 = vmatpush3.bf16.msra.mxu1 %v2749_v22  ;;  %v3510_v22 = vand.u32 4294901760, %v3193_v34  ;;  %v3513_v34 = vand.u32 4294901760, %v3210_v55 }
  0x8c   :  { %2442 = vmatprep.subr.bf16.mxu1 %v3495_v29  ;;  %2555 = vmatpush3.bf16.msra.mxu0 %v3223_v8 }
  0x8d   :  { %2317 = vmatprep.subr.mxu0 %v3496_v37  ;;  %v2563_v41 = vpack.c.bf16 %v3513_v34, %v1336_v33 }
  0x8f   :  { %2444 = vmatpush3.bf16.msra.mxu1 %v2794_v35  ;;  %v713_v35 = vand.u32 4294901760, %v712_v54 }
  0x90   :  { %2445 = vmatprep.subr.bf16.mxu1 %v3495_v29  ;;  %2318 = vmatpush3.msra.mxu0 %v3247_v28 }
  0x91   :  { %2556 = vmatprep.subr.bf16.mxu0 %v3495_v29  ;;  %2320 = vmatmul.mubr.f32.vlgmr.msra.gmra.mrb[0].mxu0 %v3510_v22 }
  0x92   :  { %2558 = vmatpush3.bf16.msra.mxu0 %v2557_v31  ;;  %2340 = vmatprep.mubr.msk.f32.mxu0 %vm2642_vm0, %v3496_v37 }
  0x93   :  { %2447 = vmatpush3.bf16.msra.mxu1 %v2837_v50  ;;  %2559 = vmatprep.subr.bf16.mxu0 %v3495_v29  ;;  %v3514_v50 = vand.u32 4294901760, %v3241_v61 }
  0x94   :  { %2128 = vmatprep.subr.mxu1 %v3496_v37 }
  0x95   :  { %v2566_v55 = vpack.c.bf16 %v3514_v50, %v1350_v4 }
  0x96   :  { %2561 = vmatpush3.bf16.msra.mxu0 %v2560_v26 }
  0x97   :  { %2129 = vmatpush3.msra.mxu1 %v2866_v38  ;;  %2562 = vmatprep.subr.bf16.mxu0 %v3495_v29  ;;  %v3515_v38 = vand.u32 4294901760, %v3059_v20 }
  0x98   :  { %2448 = vmatprep.subr.bf16.mxu1 %v3495_v29  ;;  %2131 = vmatmul.mubr.f32.vlgmr.msra.gmra.mrb[0].mxu1 %v713_v35 }
  0x99   :  { %2450 = vmatpush3.bf16.msra.mxu1 %v3107_v2  ;;  %2151 = vmatprep.mubr.msk.f32.mxu1 %vm2642_vm0, %v3496_v37  ;;  %v779_v2 = vsub.f32 %v3059_v20, %v3515_v38 }
  0x9a   :  { %2451 = vmatprep.subr.bf16.mxu1 %v3495_v29  ;;  %2564 = vmatpush3.bf16.msra.mxu0 %v2563_v41 }
  0x9b   :  { %2565 = vmatprep.subr.bf16.mxu0 %v3495_v29 }
  0x9d   :  { %2453 = vmatpush3.bf16.msra.mxu1 %v3120_v32  ;;  %v780_v32 = vand.u32 4294901760, %v779_v2 }
  0x9e   :  { %2454 = vmatprep.subr.bf16.mxu1 %v3495_v29  ;;  %2567 = vmatpush3.bf16.msra.mxu0 %v2566_v55 }
  0x9f   :  { %2338 = vmatprep.subr.mxu0 %v3496_v37 }
  0xa1   :  { %2456 = vmatpush3.bf16.msra.mxu1 %v3138_v11  ;;  %v3517_v11 = vld [vmem:[#allocation5_spill] sm:$0xff] }
  0xa2   :  { %2457 = vmatprep.subr.bf16.mxu1 %v3495_v29  ;;  %2339 = vmatpush3.msra.mxu0 %v1364_v36 }
  0xa3   :  { %2568 = vmatprep.subr.bf16.mxu0 %v3495_v29  ;;  %2341 = vmatmul.mubr.f32.vlgmr.msra.gmra.mrb[0].mxu0 %v3166_v30 }
  0xa4   :  { %2570 = vmatpush3.bf16.msra.mxu0 %v3156_v10  ;;  %2361 = vmatprep.mubr.msk.f32.mxu0 %vm2642_vm0, %v3496_v37  ;;  %v3522_v10 = vld [vmem:[#allocation9_spill] sm:$0xff] }
  0xa5   :  { %2459 = vmatpush3.bf16.msra.mxu1 %v3150_v23  ;;  %2571 = vmatprep.subr.bf16.mxu0 %v3495_v29  ;;  %v3518_v23 = vpack.c.bf16 %v2921_v49, %v3517_v11  ;;  %v3524_v49 = vpack.c.bf16 %v3522_v10, %v3523_v27 }
  0xa6   :  { %2149 = vmatprep.subr.mxu1 %v3496_v37 }
  0xa8   :  { %2573 = vmatpush3.bf16.msra.mxu0 %v3177_v0 }
  0xa9   :  { %2150 = vmatpush3.msra.mxu1 %v780_v32  ;;  %2574 = vmatprep.subr.bf16.mxu0 %v3495_v29 }
  0xaa   :  { %2460 = vmatprep.subr.bf16.mxu1 %v3495_v29  ;;  %2152 = vmatmul.mubr.f32.vlgmr.msra.gmra.mrb[0].mxu1 %v2932_v52  ;;  %v3521_v52 = vpack.c.bf16 %v3519_v7, %v3520_v6 }
  0xab   :  { %2462 = vmatpush3.bf16.msra.mxu1 %v3516_v18  ;;  %2172 = vmatprep.mubr.msk.f32.mxu1 %vm2642_vm0, %v3496_v37 }
  0xac   :  { %2463 = vmatprep.subr.bf16.mxu1 %v3495_v29  ;;  %2576 = vmatpush3.bf16.msra.mxu0 %v3199_v15 }
  0xad   :  { %2577 = vmatprep.subr.bf16.mxu0 %v3495_v29 }
  0xaf   :  { %2465 = vmatpush3.bf16.msra.mxu1 %v3518_v23 }
  0xb0   :  { %2466 = vmatprep.subr.bf16.mxu1 %v3495_v29  ;;  %2579 = vmatpush3.bf16.msra.mxu0 %v3223_v8 }
  0xb1   :  { %2359 = vmatprep.subr.mxu0 %v3496_v37 }
  0xb3   :  { %2468 = vmatpush3.bf16.msra.mxu1 %v3521_v52 }
  0xb4   :  { %2469 = vmatprep.subr.bf16.mxu1 %v3495_v29  ;;  %2360 = vmatpush3.msra.mxu0 %v3247_v28 }
  0xb5   :  { %2362 = vmatmul.mubr.f32.vlgmr.msra.gmra.mrb[0].mxu0 %v3166_v30 }
  0xb7   :  { %2471 = vmatpush3.bf16.msra.mxu1 %v3524_v49 }
  0xb8   :  { %2170 = vmatprep.subr.mxu1 %v3496_v37 }
  0xbb   :  { %2171 = vmatpush3.msra.mxu1 %v3059_v20 }
  0xbc   :  { %2173 = vmatmul.mubr.f32.vlgmr.msra.gmra.mrb[0].mxu1 %v2956_v60 }
 0x188   :  { %v1767_v0 = vpop.f32.mrb[0].mxu0 }
 0x189   :  { %v2363_v59 = vpop.f32.mrb[1].mxu0 }
 0x18f   :  { %v921_v62 = vpop.f32.mrb[0].mxu1 }
 0x190   :  { %v2580_v29 = vadd.f32 %v1767_v0, %v921_v62  ;;  %v2174_v15 = vpop.f32.mrb[1].mxu1 }
 0x192   :  { %v1772_v28 = vmul.f32 0.00390625, %v2580_v29 }
 0x194   :  { %1773 = vst [vmem:[#allocation2] sm:$0x3] %v1772_v28 }
 0x195   :  { %2628 = shalt.err (!%p2625_p4)
}
 0x196   :  { %s2629_s6 = scalar_lea.hbm %s3461_s2, 32 }
 0x197   :  { %p2630_p5 = scmp.ne.s32.totalorder %s3461_s2, %s2629_s6  ;;  %p2633_p6 = scmp.lt.u32.totalorder %s2629_s6, %s3461_s2 }
 0x199   :  { %p2635_p7 = pnand %p2633_p6, %p2630_p5 }
 0x19b   :  { %2638 = shalt.err (!%p2635_p7)
}
 0x19c   :  { %1783 = dma.vmem_to_hbm [thread:$0]  %s1781_s30, 32, %s3461_s2, [#allocation3]  }
 0x19d   :  { %2639 = dma.done.wait [#allocation3], 32  }
 0x19e   :  { %2640 = vsyncadd [#allocation3], 4294967264 }
 0x19f   :  { %1787 = vsyncpa [#allocation3], 1 }

</bundles_post_ra>
